<compile_context>
chip_gen: v6e
topology: v6e:2x2x1
jax: 0.10.0
libtpu: 0.0.40
codegen_flags: <defaults>
</compile_context>

<pallas_src>
import jax
import jax.numpy as jnp
from jax.experimental import pallas as pl
from jax.experimental.pallas import tpu as pltpu

# ---- static "args" for the synthetic Effnet ----
B, C, H, W = 2, 4, 16, 16            # input images (NCHW like PyTorch)
HW = H * W                            # 256 (= 2 lane tiles -> aligned slices)
FEAT = 64                             # enet.classifier.in_features stand-in
N_META0, N_META1 = 32, 16             # args.n_meta_dim = "32,16"
N_META_IN = 10                        # meta features (nn.Linear(10, ...))
N_DANN_HID = 100                      # barrier classifier hidden
N_DANN = 4                            # args.n_dann_dim
OUT_DIM = 8                           # args.out_dim
IN_CH = FEAT + N_META1                # 'joint' => concat(features, meta) = 80
BN_EPS = 1e-5
LANES = 128


def _a8(n):
    return ((n + 7) // 8) * 8


# ---- compact parameter-slab layout -----------------------------------------
# Every section starts at a row multiple of 8; weights and their bias column
# (and several small matrices) share rows via distinct lane ranges, so the
# slab is 120x128 f32 (~60KB) instead of 472x128 (~241KB).
RA = 0                                 # section A: 104 rows (_a8(100))
C_DANN1_W = 0                          # (100, 64)
C_DANN1_B = 64                         # (100, 1)
C_CONV_W = 65                          # (64, 4)
C_CONV_B = 69                          # (64, 1)
C_META1_W = 70                         # (32, 10)
C_META1_B = 80                         # (32, 1)
C_META2_W = 81                         # (16, 32)
C_META2_B = 113                        # (16, 1)   (max lane used = 113 < 128)
RB = RA + _a8(N_DANN_HID)              # 104, section B: 8 rows
C_DANN2_W = 0                          # (4, 100)
C_DANN2_B = 100                        # (4, 1)
RC = RB + _a8(N_DANN)                  # 112, section C: 8 rows
C_FC_WA = 0                            # (8, 64)  myfc weight, feature half
C_FC_WB = 64                           # (8, 16)  myfc weight, meta half
C_FC_B = 80                            # (8, 1)
SLAB_ROWS = RC + _a8(OUT_DIM)          # 120

# ---- merged output slab layout ----
R_OUT_LOGITS = 0
R_OUT_BARRIER = _a8(OUT_DIM)                        # 8
OUT_ROWS = _a8(R_OUT_BARRIER + N_DANN)              # 16


def effnet_kernel(x_ref, xm_ref, w_ref, out_ref):
    f32 = jnp.float32

    def wgt(row, col, r, c):
        return w_ref[row:row + r, col:col + c]

    # ---- backbone stand-in, feature-major / lane-dense ---------------------
    xT = x_ref[...]                                               # (C, B*HW)
    conv_w = wgt(RA, C_CONV_W, FEAT, C)
    conv_b = wgt(RA, C_CONV_B, FEAT, 1)
    hT = jnp.dot(conv_w, xT, preferred_element_type=f32) + conv_b
    hT = hT * jax.nn.sigmoid(hT)                                  # Swish (64, 512)

    # global average pool per image (== .squeeze(-1).squeeze(-1) after GAP):
    # HW = 256 = 2 lane tiles, so each per-image slice is lane-aligned and the
    # pool is two cheap XLU lane reductions (no iota pool matrix, no extra MXU).
    feats = [jnp.sum(hT[:, b * HW:(b + 1) * HW], axis=1, keepdims=True) * (1.0 / HW)
             for b in range(B)]
    featT = jnp.concatenate(feats, axis=1)                        # (FEAT, B)

    # ---- meta branch: (Linear+BN folded) -> Swish -> Dropout(id) -> ... ----
    xmT = xm_ref[...]                                             # (10, B)
    a1 = (jnp.dot(wgt(RA, C_META1_W, N_META0, N_META_IN), xmT,
                  preferred_element_type=f32)
          + wgt(RA, C_META1_B, N_META0, 1))
    a1 = a1 * jax.nn.sigmoid(a1)
    mT = (jnp.dot(wgt(RA, C_META2_W, N_META1, N_META0), a1,
                  preferred_element_type=f32)
          + wgt(RA, C_META2_B, N_META1, 1))
    mT = mT * jax.nn.sigmoid(mT)                                  # (N_META1, B)

    # ---- DANN barrier classifier (ReverseLayerF == identity in forward) ----
    bx = (jnp.dot(wgt(RA, C_DANN1_W, N_DANN_HID, FEAT), featT,
                  preferred_element_type=f32)
          + wgt(RA, C_DANN1_B, N_DANN_HID, 1))
    bx = jnp.maximum(bx, 0.0)                                     # BN folded + ReLU
    barrierT = (jnp.dot(wgt(RB, C_DANN2_W, N_DANN, N_DANN_HID), bx,
                        preferred_element_type=f32)
                + wgt(RB, C_DANN2_B, N_DANN, 1))                  # (N_DANN, B)

    # ---- myfc on torch.cat((x, x_meta), dim=1): concat folded into a split
    #      matmul; the 5 eval-mode dropout heads average to the identity. ----
    logitsT = (jnp.dot(wgt(RC, C_FC_WA, OUT_DIM, FEAT), featT,
                       preferred_element_type=f32)
               + jnp.dot(wgt(RC, C_FC_WB, OUT_DIM, N_META1), mT,
                         preferred_element_type=f32)
               + wgt(RC, C_FC_B, OUT_DIM, 1))                     # (OUT_DIM, B)

    # ---- single lane-padded output slab -> one writeback DMA ---------------
    out_ref[...] = jnp.zeros_like(out_ref)
    out_ref[R_OUT_LOGITS:R_OUT_LOGITS + OUT_DIM, 0:B] = logitsT
    out_ref[R_OUT_BARRIER:R_OUT_BARRIER + N_DANN, 0:B] = barrierT


# ---------------------------------------------------------------------------
# parameter construction / packing
# ---------------------------------------------------------------------------
def init_params(key):
    ks = jax.random.split(key, 12)

    def lin(kw, kb, fan_out, fan_in):
        # PyTorch-native (out, in) layout
        w = jax.random.normal(kw, (fan_out, fan_in), jnp.float32) / jnp.sqrt(
            jnp.float32(fan_in))
        b = 0.1 * jax.random.normal(kb, (fan_out,), jnp.float32)
        return w, b

    def bn(dim):
        # gamma=1, beta=0, running_mean=0, running_var=1 (PyTorch defaults)
        return (jnp.ones((dim,), jnp.float32), jnp.zeros((dim,), jnp.float32),
                jnp.zeros((dim,), jnp.float32), jnp.ones((dim,), jnp.float32))

    p = {}
    p['conv_w'], p['conv_b'] = lin(ks[0], ks[1], FEAT, C)
    p['meta1_w'], p['meta1_b'] = lin(ks[2], ks[3], N_META0, N_META_IN)
    p['meta_bn1'] = bn(N_META0)
    p['meta2_w'], p['meta2_b'] = lin(ks[4], ks[5], N_META1, N_META0)
    p['meta_bn2'] = bn(N_META1)
    p['dann1_w'], p['dann1_b'] = lin(ks[6], ks[7], N_DANN_HID, FEAT)
    p['dann_bn'] = bn(N_DANN_HID)
    p['dann2_w'], p['dann2_b'] = lin(ks[8], ks[9], N_DANN, N_DANN_HID)
    p['fc_w'], p['fc_b'] = lin(ks[10], ks[11], OUT_DIM, IN_CH)
    return p


def pack_params(p):
    """Fold eval-mode BatchNorms into the preceding Linears and pack everything
    into one compact (SLAB_ROWS, 128) f32 slab -> a single parameter DMA."""
    def fold(w, b, bn):
        gamma, beta, mean, var = bn
        s = gamma * jax.lax.rsqrt(var + BN_EPS)
        return w * s[:, None], (b - mean) * s + beta

    w1, b1 = fold(p['meta1_w'], p['meta1_b'], p['meta_bn1'])
    w2, b2 = fold(p['meta2_w'], p['meta2_b'], p['meta_bn2'])
    wd1, bd1 = fold(p['dann1_w'], p['dann1_b'], p['dann_bn'])

    slab = jnp.zeros((SLAB_ROWS, LANES), jnp.float32)

    def put(s, row, col, a):
        a = jnp.asarray(a, jnp.float32)
        if a.ndim == 1:
            a = a[:, None]
        return s.at[row:row + a.shape[0], col:col + a.shape[1]].set(a)

    slab = put(slab, RA, C_DANN1_W, wd1)
    slab = put(slab, RA, C_DANN1_B, bd1)
    slab = put(slab, RA, C_CONV_W, p['conv_w'])
    slab = put(slab, RA, C_CONV_B, p['conv_b'])
    slab = put(slab, RA, C_META1_W, w1)
    slab = put(slab, RA, C_META1_B, b1)
    slab = put(slab, RA, C_META2_W, w2)
    slab = put(slab, RA, C_META2_B, b2)
    slab = put(slab, RB, C_DANN2_W, p['dann2_w'])
    slab = put(slab, RB, C_DANN2_B, p['dann2_b'])
    slab = put(slab, RC, C_FC_WA, p['fc_w'][:, 0:FEAT])
    slab = put(slab, RC, C_FC_WB, p['fc_w'][:, FEAT:IN_CH])
    slab = put(slab, RC, C_FC_B, p['fc_b'])
    return slab


# ---------------------------------------------------------------------------
# wrapper
# ---------------------------------------------------------------------------
@jax.jit
def effnet_forward(x_nchw, x_meta, slab):
    # lane-dense, feature-major image layout: (C, B*H*W) = (4, 512)
    xT = jnp.transpose(x_nchw, (1, 0, 2, 3)).reshape(C, B * HW)
    xmT = x_meta.T                                       # (N_META_IN, B)

    vmem = lambda: pl.BlockSpec(memory_space=pltpu.MemorySpace.VMEM)
    cost = pl.CostEstimate(
        flops=340_000,
        transcendentals=33_000,
        bytes_accessed=(C * B * HW * 4 + N_META_IN * B * 4
                        + SLAB_ROWS * LANES * 4 + OUT_ROWS * LANES * 4))

    out_pad = pl.pallas_call(
        effnet_kernel,
        out_shape=jax.ShapeDtypeStruct((OUT_ROWS, LANES), jnp.float32),
        in_specs=[vmem(), vmem(), vmem()],
        out_specs=vmem(),
        cost_estimate=cost,
    )(xT, xmT, slab)

    logits = out_pad[R_OUT_LOGITS:R_OUT_LOGITS + OUT_DIM, 0:B].T       # (B, OUT_DIM)
    barrier = out_pad[R_OUT_BARRIER:R_OUT_BARRIER + N_DANN, 0:B].T     # (B, N_DANN)
    return logits, barrier


def effnet_reference(x_nchw, x_meta, p):
    """Pure-JAX reference with the unfolded (Linear -> BN) parameters."""
    def bn_eval(v, bn):
        gamma, beta, mean, var = bn
        return (v - mean) / jnp.sqrt(var + BN_EPS) * gamma + beta

    x2d = jnp.transpose(x_nchw, (0, 2, 3, 1)).reshape(B * HW, C)
    h = x2d @ p['conv_w'].T + p['conv_b']
    h = h * jax.nn.sigmoid(h)
    feat = h.reshape(B, HW, FEAT).mean(axis=1)

    m = x_meta @ p['meta1_w'].T + p['meta1_b']
    m = bn_eval(m, p['meta_bn1']); m = m * jax.nn.sigmoid(m)
    m = m @ p['meta2_w'].T + p['meta2_b']
    m = bn_eval(m, p['meta_bn2']); m = m * jax.nn.sigmoid(m)

    bx = feat @ p['dann1_w'].T + p['dann1_b']
    bx = jnp.maximum(bn_eval(bx, p['dann_bn']), 0.0)
    barrier = bx @ p['dann2_w'].T + p['dann2_b']

    cat = jnp.concatenate([feat, m], axis=1)
    logits = cat @ p['fc_w'].T + p['fc_b']
    return logits, barrier


if __name__ == "__main__":
    key = jax.random.PRNGKey(0)
    kx, km, kp = jax.random.split(key, 3)
    x = jax.random.normal(kx, (B, C, H, W), jnp.float32)        # NCHW like PyTorch
    x_meta = jax.random.normal(km, (B, N_META_IN), jnp.float32)
    params = init_params(kp)
    slab = pack_params(params)

    out, barrier_out = effnet_forward(x, x_meta, slab)
    jax.block_until_ready((out, barrier_out))
    assert out.shape == (B, OUT_DIM)
    assert barrier_out.shape == (B, N_DANN)

    ref_out, ref_barrier = effnet_reference(x, x_meta, params)
    assert jnp.allclose(out, ref_out, rtol=2e-3, atol=2e-3)
    assert jnp.allclose(barrier_out, ref_barrier, rtol=2e-3, atol=2e-3)
    print("KERNEL_OK")
</pallas_src>

<mosaic_0001>
module attributes {stable_mosaic.version = 11 : i64} {
  func.func @effnet_kernel(%arg0: memref<4x512xf32, #tpu.memory_space<vmem>>, %arg1: memref<10x2xf32, #tpu.memory_space<vmem>>, %arg2: memref<120x128xf32, #tpu.memory_space<vmem>>, %arg3: memref<16x128xf32, #tpu.memory_space<vmem>>) attributes {dimension_semantics = [], scalar_prefetch = 0 : i64, scratch_operands = 0 : i64, tpu.core_type = #tpu.core_type<tc>} {
    %c0 = arith.constant 0 : index
    %c0_0 = arith.constant 0 : index
    %0 = vector.load %arg0[%c0, %c0_0] : memref<4x512xf32, #tpu.memory_space<vmem>>, vector<4x512xf32>
    %c0_1 = arith.constant 0 : index
    %c65 = arith.constant 65 : index
    %1 = vector.load %arg2[%c0_1, %c65] : memref<120x128xf32, #tpu.memory_space<vmem>>, vector<64x4xf32>
    %c0_2 = arith.constant 0 : index
    %c69 = arith.constant 69 : index
    %2 = vector.load %arg2[%c0_2, %c69] : memref<120x128xf32, #tpu.memory_space<vmem>>, vector<64x1xf32>
    %cst = arith.constant dense<0.000000e+00> : vector<64x512xf32>
    %3 = tpu.matmul %1, %0, %cst {dimension_numbers = #tpu.dot_dimension_numbers<[1], [0], [0], [1], [0, 0, 1, 1], [], []>} : vector<64x4xf32>, vector<4x512xf32>, vector<64x512xf32> -> vector<64x512xf32>
    %4 = vector.broadcast %2 : vector<64x1xf32> to vector<64x512xf32>
    %5 = arith.addf %3, %4 : vector<64x512xf32>
    %6 = arith.negf %5 : vector<64x512xf32>
    %7 = math.exp %6 : vector<64x512xf32>
    %cst_3 = arith.constant 1.000000e+00 : f32
    %8 = vector.broadcast %cst_3 : f32 to vector<64x512xf32>
    %9 = arith.addf %8, %7 : vector<64x512xf32>
    %10 = arith.divf %8, %9 : vector<64x512xf32>
    %11 = arith.mulf %5, %10 : vector<64x512xf32>
    %12 = vector.extract_strided_slice %11 {offsets = [0, 0], sizes = [64, 256], strides = [1, 1]} : vector<64x512xf32> to vector<64x256xf32>
    %cst_4 = arith.constant dense<0.000000e+00> : vector<64xf32>
    %13 = vector.multi_reduction <add>, %12, %cst_4 [1] : vector<64x256xf32> to vector<64xf32>
    %14 = vector.shape_cast %13 : vector<64xf32> to vector<64x1xf32>
    %cst_5 = arith.constant 3.906250e-03 : f32
    %15 = vector.broadcast %cst_5 : f32 to vector<64x1xf32>
    %16 = arith.mulf %14, %15 : vector<64x1xf32>
    %17 = vector.extract_strided_slice %11 {offsets = [0, 256], sizes = [64, 256], strides = [1, 1]} : vector<64x512xf32> to vector<64x256xf32>
    %cst_6 = arith.constant dense<0.000000e+00> : vector<64xf32>
    %18 = vector.multi_reduction <add>, %17, %cst_6 [1] : vector<64x256xf32> to vector<64xf32>
    %19 = vector.shape_cast %18 : vector<64xf32> to vector<64x1xf32>
    %cst_7 = arith.constant 3.906250e-03 : f32
    %20 = vector.broadcast %cst_7 : f32 to vector<64x1xf32>
    %21 = arith.mulf %19, %20 : vector<64x1xf32>
    %22 = tpu.concatenate %16, %21 in 1 : vector<64x1xf32>, vector<64x1xf32> -> vector<64x2xf32>
    %c0_8 = arith.constant 0 : index
    %c0_9 = arith.constant 0 : index
    %23 = vector.load %arg1[%c0_8, %c0_9] : memref<10x2xf32, #tpu.memory_space<vmem>>, vector<10x2xf32>
    %c0_10 = arith.constant 0 : index
    %c70 = arith.constant 70 : index
    %24 = vector.load %arg2[%c0_10, %c70] : memref<120x128xf32, #tpu.memory_space<vmem>>, vector<32x10xf32>
    %cst_11 = arith.constant dense<0.000000e+00> : vector<32x2xf32>
    %25 = tpu.matmul %24, %23, %cst_11 {dimension_numbers = #tpu.dot_dimension_numbers<[1], [0], [0], [1], [0, 0, 1, 1], [], []>} : vector<32x10xf32>, vector<10x2xf32>, vector<32x2xf32> -> vector<32x2xf32>
    %c0_12 = arith.constant 0 : index
    %c80 = arith.constant 80 : index
    %26 = vector.load %arg2[%c0_12, %c80] : memref<120x128xf32, #tpu.memory_space<vmem>>, vector<32x1xf32>
    %27 = vector.broadcast %26 : vector<32x1xf32> to vector<32x2xf32>
    %28 = arith.addf %25, %27 : vector<32x2xf32>
    %29 = arith.negf %28 : vector<32x2xf32>
    %30 = math.exp %29 : vector<32x2xf32>
    %cst_13 = arith.constant 1.000000e+00 : f32
    %31 = vector.broadcast %cst_13 : f32 to vector<32x2xf32>
    %32 = arith.addf %31, %30 : vector<32x2xf32>
    %33 = arith.divf %31, %32 : vector<32x2xf32>
    %34 = arith.mulf %28, %33 : vector<32x2xf32>
    %c0_14 = arith.constant 0 : index
    %c81 = arith.constant 81 : index
    %35 = vector.load %arg2[%c0_14, %c81] : memref<120x128xf32, #tpu.memory_space<vmem>>, vector<16x32xf32>
    %cst_15 = arith.constant dense<0.000000e+00> : vector<16x2xf32>
    %36 = tpu.matmul %35, %34, %cst_15 {dimension_numbers = #tpu.dot_dimension_numbers<[1], [0], [0], [1], [0, 0, 1, 1], [], []>} : vector<16x32xf32>, vector<32x2xf32>, vector<16x2xf32> -> vector<16x2xf32>
    %c0_16 = arith.constant 0 : index
    %c113 = arith.constant 113 : index
    %37 = vector.load %arg2[%c0_16, %c113] : memref<120x128xf32, #tpu.memory_space<vmem>>, vector<16x1xf32>
    %38 = vector.broadcast %37 : vector<16x1xf32> to vector<16x2xf32>
    %39 = arith.addf %36, %38 : vector<16x2xf32>
    %40 = arith.negf %39 : vector<16x2xf32>
    %41 = math.exp %40 : vector<16x2xf32>
    %cst_17 = arith.constant 1.000000e+00 : f32
    %42 = vector.broadcast %cst_17 : f32 to vector<16x2xf32>
    %43 = arith.addf %42, %41 : vector<16x2xf32>
    %44 = arith.divf %42, %43 : vector<16x2xf32>
    %45 = arith.mulf %39, %44 : vector<16x2xf32>
    %c0_18 = arith.constant 0 : index
    %c0_19 = arith.constant 0 : index
    %46 = vector.load %arg2[%c0_18, %c0_19] : memref<120x128xf32, #tpu.memory_space<vmem>>, vector<100x64xf32>
    %cst_20 = arith.constant dense<0.000000e+00> : vector<100x2xf32>
    %47 = tpu.matmul %46, %22, %cst_20 {dimension_numbers = #tpu.dot_dimension_numbers<[1], [0], [0], [1], [0, 0, 1, 1], [], []>} : vector<100x64xf32>, vector<64x2xf32>, vector<100x2xf32> -> vector<100x2xf32>
    %c0_21 = arith.constant 0 : index
    %c64 = arith.constant 64 : index
    %48 = vector.load %arg2[%c0_21, %c64] : memref<120x128xf32, #tpu.memory_space<vmem>>, vector<100x1xf32>
    %49 = vector.broadcast %48 : vector<100x1xf32> to vector<100x2xf32>
    %50 = arith.addf %47, %49 : vector<100x2xf32>
    %cst_22 = arith.constant 0.000000e+00 : f32
    %51 = vector.broadcast %cst_22 : f32 to vector<100x2xf32>
    %52 = arith.maximumf %50, %51 : vector<100x2xf32>
    %c104 = arith.constant 104 : index
    %c0_23 = arith.constant 0 : index
    %53 = vector.load %arg2[%c104, %c0_23] : memref<120x128xf32, #tpu.memory_space<vmem>>, vector<4x100xf32>
    %cst_24 = arith.constant dense<0.000000e+00> : vector<4x2xf32>
    %54 = tpu.matmul %53, %52, %cst_24 {dimension_numbers = #tpu.dot_dimension_numbers<[1], [0], [0], [1], [0, 0, 1, 1], [], []>} : vector<4x100xf32>, vector<100x2xf32>, vector<4x2xf32> -> vector<4x2xf32>
    %c104_25 = arith.constant 104 : index
    %c100 = arith.constant 100 : index
    %55 = vector.load %arg2[%c104_25, %c100] : memref<120x128xf32, #tpu.memory_space<vmem>>, vector<4x1xf32>
    %56 = vector.broadcast %55 : vector<4x1xf32> to vector<4x2xf32>
    %57 = arith.addf %54, %56 : vector<4x2xf32>
    %c112 = arith.constant 112 : index
    %c0_26 = arith.constant 0 : index
    %58 = vector.load %arg2[%c112, %c0_26] : memref<120x128xf32, #tpu.memory_space<vmem>>, vector<8x64xf32>
    %cst_27 = arith.constant dense<0.000000e+00> : vector<8x2xf32>
    %59 = tpu.matmul %58, %22, %cst_27 {dimension_numbers = #tpu.dot_dimension_numbers<[1], [0], [0], [1], [0, 0, 1, 1], [], []>} : vector<8x64xf32>, vector<64x2xf32>, vector<8x2xf32> -> vector<8x2xf32>
    %c112_28 = arith.constant 112 : index
    %c64_29 = arith.constant 64 : index
    %60 = vector.load %arg2[%c112_28, %c64_29] : memref<120x128xf32, #tpu.memory_space<vmem>>, vector<8x16xf32>
    %cst_30 = arith.constant dense<0.000000e+00> : vector<8x2xf32>
    %61 = tpu.matmul %60, %45, %cst_30 {dimension_numbers = #tpu.dot_dimension_numbers<[1], [0], [0], [1], [0, 0, 1, 1], [], []>} : vector<8x16xf32>, vector<16x2xf32>, vector<8x2xf32> -> vector<8x2xf32>
    %62 = arith.addf %59, %61 : vector<8x2xf32>
    %c112_31 = arith.constant 112 : index
    %c80_32 = arith.constant 80 : index
    %63 = vector.load %arg2[%c112_31, %c80_32] : memref<120x128xf32, #tpu.memory_space<vmem>>, vector<8x1xf32>
    %64 = vector.broadcast %63 : vector<8x1xf32> to vector<8x2xf32>
    %65 = arith.addf %62, %64 : vector<8x2xf32>
    %cst_33 = arith.constant 0.000000e+00 : f32
    %66 = vector.broadcast %cst_33 : f32 to vector<16x128xf32>
    %c0_34 = arith.constant 0 : index
    %c0_35 = arith.constant 0 : index
    %67 = vector.load %arg3[%c0_34, %c0_35] : memref<16x128xf32, #tpu.memory_space<vmem>>, vector<16x128xf32>
    tpu.vector_store %arg3[%c0_34, %c0_35], %66 {strides = array<i32>} : memref<16x128xf32, #tpu.memory_space<vmem>>, vector<16x128xf32>,
    %c0_36 = arith.constant 0 : index
    %c0_37 = arith.constant 0 : index
    %68 = vector.load %arg3[%c0_36, %c0_37] : memref<16x128xf32, #tpu.memory_space<vmem>>, vector<8x2xf32>
    tpu.vector_store %arg3[%c0_36, %c0_37], %65 {strides = array<i32>} : memref<16x128xf32, #tpu.memory_space<vmem>>, vector<8x2xf32>,
    %c8 = arith.constant 8 : index
    %c0_38 = arith.constant 0 : index
    %69 = vector.load %arg3[%c8, %c0_38] : memref<16x128xf32, #tpu.memory_space<vmem>>, vector<4x2xf32>
    tpu.vector_store %arg3[%c8, %c0_38], %57 {strides = array<i32>} : memref<16x128xf32, #tpu.memory_space<vmem>>, vector<4x2xf32>,
    return
  }
}

</mosaic_0001>

<bundles_post_ra>
// kernel: effnet_forward.1
= control target key start
LH: loop header
LB: loop body
LE: loop exit
PB: predicated region body
PF: predicated region fallthrough
CT: control target
= control target key end

     0   :  { %v2492_v2 = vmov 0.0   ;;  %s1856_s16 = smov 63   ;;  %vm101_vm0 = vcmask 1043456   ;;  %s1857_s5 = smov 58   ;;  %v1858_v13 = vmov 69   ;;  %v2490_v14 = vmov 80   ;;  %s2486_s2 = inlined_call_operand.vmem [shape: f32[120,128], index: 2, kind: input, shape index: {}]   ;;  %s2487_s0 = inlined_call_operand.vmem [shape: f32[4,512], index: 0, kind: input, shape index: {}]   ;;  %s2488_s1 = inlined_call_operand.vmem [shape: f32[10,2], index: 1, kind: input, shape index: {}]   ;;  %s2489_s3 = inlined_call_operand.vmem [shape: f32[16,128], index: 3, kind: output, shape index: {}]  }
   0x1   :  { %v1889_v0 = vld [vmem:[%s2486_s2 + $0x38] sm:$0xff]  ;;  %v1894_v1 = vld [vmem:[%s2486_s2 + $0x28] sm:$0xff]  ;;  %204 = vmatprep.mubr.f32.mxu1 %v2492_v2  ;;  %174 = vmatprep.mubr.f32.mxu0 %v2492_v2  ;;  %v1903_v3 = vld [vmem:[%s2486_s2 + $0x30] sm:$0xff]  ;;  %vm84_vm1 = vcmask 31744   ;;  %vm676_vm2 = vcmask 1041408   ;;  %vm667_vm3 = vcmask 80896  }
   0x2   :  { %78 = vrot.lane.b32.xlu1 %v1889_v0, %s1856_s16  ;;  %74 = vrot.lane.b32.xlu0 %v1894_v1, %s1856_s16  ;;  %v1908_v4 = vld [vmem:[%s2486_s2] sm:$0xff]  ;;  %v15_v6 = vld [vmem:[%s2487_s0 + $0x8] sm:$0xff]  ;;  %vm1861_vm4 = vmmov 0   ;;  %s1864_s22 = smov 64   ;;  %vm624_vm5 = vcmask 7168   ;;  %vm809_vm6 = vcmask 261120  }
   0x3   :  { %v14_v5 = vld [vmem:[%s2487_s0] sm:$0xff]  ;;  %v83_v8 = vcombine.high %v15_v6, %v15_v6  ;;  %v1921_v9 = vld [vmem:[%s2486_s2 + $0x8] sm:$0xff]  ;;  %v1926_v10 = vld [vmem:[%s2486_s2 + $0x10] sm:$0xff]  ;;  %1682 = vset.pattern.permute.xlu0 %v1858_v13  ;;  %1683 = vset.pattern.permute.xlu1 %v1858_v13  ;;  %vm981_vm7 = vcmask 523264   ;;  %vm1237_vm8 = vcmask 130048   ;;  %vm1157_vm9 = vcmask 818176  }
   0x4   :  { %v82_v7 = vcombine.high %v14_v5, %v14_v5  ;;  %2495 = vst [vmem:[#allocation2_spill] sm:$0xff] %v1926_v10  ;;  %v1939_v11 = vld [vmem:[%s2486_s2 + $0x18] sm:$0xff]  ;;  %v1944_v12 = vld [vmem:[%s2486_s2 + $0x20] sm:$0xff]  ;;  %v634_v17 = vld [vmem:[%s2488_s1 + $0x8] sm:$0x3]  ;;  %vm1389_vm10 = vcmask 15360  }
   0x5   :  { %v633_v22 = vld [vmem:[%s2488_s1] sm:$0xff]  ;;  %s1860_s1 = smov 47   ;;  %vm1391_vm11 = vcmask 11264  }
   0x6   :  { %76 = vrot.lane.b32.xlu0 %v1903_v3, %s1856_s16  ;;  %64 = vrot.lane.b32.xlu1 %v1908_v4, %s1856_s16 }
   0x7   :  { %1669 = vmatprep.subr.msk.mxu1 %vm101_vm0, %v82_v7  ;;  %1397 = vmatprep.subr.msk.mxu0 %vm101_vm0, %v82_v7 }
   0x8   :  { %1670 = vmatpush1.msk.msra.mxu1 %vm101_vm0, %v14_v5  ;;  %1398 = vmatpush1.msk.msra.mxu0 %vm101_vm0, %v14_v5 }
   0x9   :  { %1407 = vmatprep.subr.msk.mxu1 %vm101_vm0, %v83_v8  ;;  %1559 = vmatprep.subr.mxu0 %v2492_v2 }
   0xa   :  { %66 = vrot.lane.b32.xlu0 %v1921_v9, %s1856_s16  ;;  %68 = vrot.lane.b32.xlu1 %v1926_v10, %s1856_s16 }
   0xe   :  { %70 = vrot.lane.b32.xlu0 %v1939_v11, %s1856_s16  ;;  %72 = vrot.lane.b32.xlu1 %v1944_v12, %s1856_s16 }
  0x12   :  { %659 = vrot.lane.b32.xlu0 %v1908_v4, %s1857_s5  ;;  %661 = vrot.lane.b32.xlu1 %v1921_v9, %s1857_s5 }
  0x16   :  { %663 = vrot.lane.b32.xlu0 %v1926_v10, %s1857_s5  ;;  %665 = vrot.lane.b32.xlu1 %v1939_v11, %s1857_s5 }
  0x1a   :  { %61 = vperm.xlu0 %1682, %v1889_v0   ;;  %56 = vperm.xlu1 %1683, %v1903_v3  }
  0x1e   :  { %46 = vperm.xlu0 %1682, %v1944_v12   ;;  %51 = vperm.xlu1 %1683, %v1894_v1  }
  0x22   :  { %36 = vperm.xlu0 %1682, %v1926_v10   ;;  %41 = vperm.xlu1 %1683, %v1939_v11  }
  0x26   :  { %26 = vperm.xlu0 %1682, %v1908_v4   ;;  %31 = vperm.xlu1 %1683, %v1921_v9  }
  0x2a   :  { %1684 = vset.pattern.permute.xlu0 %v2490_v14  ;;  %1685 = vset.pattern.permute.xlu1 %v2490_v14 }
  0x2b   :  { %656 = vperm.xlu0 %1684, %v1939_v11   ;;  %651 = vperm.xlu1 %1685, %v1926_v10  }
  0x2f   :  { %646 = vperm.xlu1 %1685, %v1921_v9  }
  0x74   :  { %v79_v15 = vpop.permute.xlu1 %78  ;;  %v75_v16 = vpop.permute.xlu0 %74 }
  0x75   :  { %1404 = vmatmul.mubr.msk.f32.vlgmr.msra.gmra.mxu1 %vm84_vm1, %v75_v16 }
  0x76   :  { %210 = vmatprep.mubr.f32.mxu1 %v2492_v2  ;;  %1408 = vmatpush1.msk.msra.mxu1 %vm101_vm0, %v15_v6 }
  0x77   :  { %1538 = vmatprep.subr.msk.mxu1 %vm676_vm2, %v634_v17 }
  0x78   :  { %v77_v18 = vpop.permute.xlu0 %76  ;;  %v65_v19 = vpop.permute.xlu1 %64 }
  0x79   :  { %1399 = vmatmul.mubr.msk.f32.vlgmr.msra.gmra.mxu0 %vm84_vm1, %v65_v19  ;;  %1405 = vmatmul.mubr.msk.f32.gmra.mxu1 %vm84_vm1, %v77_v18 }
  0x7a   :  { %180 = vmatprep.mubr.f32.mxu0 %v2492_v2  ;;  %216 = vmatprep.mubr.f32.mxu1 %v2492_v2 }
  0x7c   :  { %v67_v20 = vpop.permute.xlu0 %66  ;;  %v69_v21 = vpop.permute.xlu1 %68 }
  0x7d   :  { %1400 = vmatmul.mubr.msk.f32.gmra.mxu0 %vm84_vm1, %v67_v20  ;;  %1406 = vmatmul.mubr.msk.f32.gmra.mxu1 %vm84_vm1, %v79_v15 }
  0x7e   :  { %186 = vmatprep.mubr.f32.mxu0 %v2492_v2  ;;  %287 = vmatprep.mubr.f32.mxu1 %v2492_v2 }
  0x80   :  { %v71_v23 = vpop.permute.xlu0 %70  ;;  %v73_v24 = vpop.permute.xlu1 %72 }
  0x81   :  { %1401 = vmatmul.mubr.msk.f32.gmra.mxu0 %vm84_vm1, %v69_v21  ;;  %1409 = vmatmul.mubr.msk.f32.vlgmr.msra.gmra.mxu1 %vm84_vm1, %v65_v19 }
  0x82   :  { %192 = vmatprep.mubr.f32.mxu0 %v2492_v2  ;;  %293 = vmatprep.mubr.f32.mxu1 %v2492_v2 }
  0x83   :  { %1539 = vmatpush3.msk.msra.mxu1 %vm676_vm2, %v634_v17 }
  0x84   :  { %1540 = vmatprep.subr.mxu1 %v633_v22  ;;  %v660_v25 = vpop.permute.xlu0 %659  ;;  %v662_v26 = vpop.permute.xlu1 %661 }
  0x85   :  { %1402 = vmatmul.mubr.msk.f32.gmra.mxu0 %vm84_vm1, %v71_v23  ;;  %1410 = vmatmul.mubr.msk.f32.gmra.mxu1 %vm84_vm1, %v67_v20 }
  0x86   :  { %198 = vmatprep.mubr.f32.mxu0 %v2492_v2  ;;  %299 = vmatprep.mubr.f32.mxu1 %v2492_v2 }
  0x87   :  { %1541 = vmatpush3.msra.mxu1 %v633_v22 }
  0x88   :  { %v664_v27 = vpop.permute.xlu0 %663  ;;  %v666_v28 = vpop.permute.xlu1 %665 }
  0x89   :  { %1403 = vmatmul.mubr.msk.f32.gmra.mxu0 %vm84_vm1, %v73_v24  ;;  %1411 = vmatmul.mubr.msk.f32.gmra.mxu1 %vm84_vm1, %v69_v21 }
  0x8a   :  { %305 = vmatprep.mubr.f32.mxu1 %v2492_v2 }
  0x8d   :  { %1412 = vmatmul.mubr.msk.f32.gmra.mxu1 %vm84_vm1, %v71_v23 }
  0x8e   :  { %311 = vmatprep.mubr.f32.mxu1 %v2492_v2 }
  0x91   :  { %1413 = vmatmul.mubr.msk.f32.gmra.mxu1 %vm84_vm1, %v73_v24 }
  0x92   :  { %317 = vmatprep.mubr.f32.mxu1 %v2492_v2 }
  0x95   :  { %1414 = vmatmul.mubr.msk.f32.gmra.mxu1 %vm84_vm1, %v75_v16  ;;  %v2004_v29 = vpop.permute.xlu1 %56  ;;  %v2008_v32 = vpop.permute.xlu0 %61 }
  0x96   :  { %323 = vmatprep.mubr.f32.mxu1 %v2492_v2 }
  0x99   :  { %1415 = vmatmul.mubr.msk.f32.gmra.mxu1 %vm84_vm1, %v77_v18  ;;  %v2006_v30 = vpop.permute.xlu1 %51  ;;  %v2021_v43 = vpop.permute.xlu0 %46 }
  0x9a   :  { %329 = vmatprep.mubr.f32.mxu1 %v2492_v2 }
  0x9d   :  { %1416 = vmatmul.mubr.msk.f32.gmra.mxu1 %vm84_vm1, %v79_v15  ;;  %v2035_v56 = vpop.permute.xlu0 %36  ;;  %v2040_v61 = vpop.permute.xlu1 %41 }
  0x9e   :  { %1542 = vmatprep.mubr.msk.f32.mxu1 %vm667_vm3, %v660_v25 }
  0xa1   :  { %1543 = vmatmul.mubr.msk.f32.vlgmr.msra.gmra.mxu1 %vm667_vm3, %v662_v26  ;;  %v2044_v6 = vpop.permute.xlu0 %26  ;;  %v2053_v19 = vpop.permute.xlu1 %31 }
  0xa2   :  { %1545 = vmatprep.mubr.msk.f32.mxu1 %vm667_vm3, %v664_v27 }
  0xa5   :  { %1546 = vmatmul.mubr.msk.f32.gmra.mxu1 %vm667_vm3, %v666_v28 }
 0x135   :  { %v206_v31 = vpop.f32.mrf.mxu1 }
 0x136   :  { %v2011_v33 = vadd.f32 %v206_v31, %v2006_v30 }
 0x137   :  { %v208_v34 = vpop.f32.mrf.mxu1 }
 0x138   :  { %v1437_v35 = vmul.f32 -1.442695, %v2011_v33  ;;  %v2015_v36 = vadd.f32 %v208_v34, %v2006_v30 }
 0x139   :  { %v176_v37 = vpop.f32.mrf.mxu0  ;;  %v212_v38 = vpop.f32.mrf.mxu1 }
 0x13a   :  { %1695 = vpow2.f32 %v1437_v35  ;;  %v1438_v39 = vmul.f32 -1.442695, %v2015_v36  ;;  %v2019_v40 = vadd.f32 %v212_v38, %v2004_v29  ;;  %v2051_v18 = vadd.f32 %v176_v37, %v2044_v6 }
 0x13b   :  { %v178_v41 = vpop.f32.mrf.mxu0  ;;  %v214_v42 = vpop.f32.mrf.mxu1 }
 0x13c   :  { %1697 = vpow2.f32 %v1438_v39  ;;  %v1441_v44 = vmul.f32 -1.442695, %v2019_v40  ;;  %v2025_v45 = vadd.f32 %v214_v42, %v2004_v29  ;;  %v2056_v24 = vadd.f32 %v178_v41, %v2044_v6 }
 0x13d   :  { %v182_v46 = vpop.f32.mrf.mxu0  ;;  %v218_v47 = vpop.f32.mrf.mxu1  ;;  %v1417_v31 = vmul.f32 -1.442695, %v2051_v18 }
 0x13e   :  { %v2028_v48 = vadd.f32 %v218_v47, %v2008_v32  ;;  %1699 = vpow2.f32 %v1441_v44  ;;  %v1442_v49 = vmul.f32 -1.442695, %v2025_v45  ;;  %v2059_v26 = vadd.f32 %v182_v46, %v2053_v19 }
 0x13f   :  { %v184_v50 = vpop.f32.mrf.mxu0  ;;  %v220_v51 = vpop.f32.mrf.mxu1  ;;  %v1418_v42 = vmul.f32 -1.442695, %v2056_v24 }
 0x140   :  { %v1445_v52 = vmul.f32 -1.442695, %v2028_v48  ;;  %1701 = vpow2.f32 %v1442_v49  ;;  %v2033_v53 = vadd.f32 %v220_v51, %v2008_v32  ;;  %v2063_v34 = vadd.f32 %v184_v50, %v2053_v19 }
 0x141   :  { %v188_v54 = vpop.f32.mrf.mxu0  ;;  %v289_v55 = vpop.f32.mrf.mxu1  ;;  %v1421_v46 = vmul.f32 -1.442695, %v2059_v26 }
 0x142   :  { %1703 = vpow2.f32 %v1445_v52  ;;  %v1446_v57 = vmul.f32 -1.442695, %v2033_v53  ;;  %v2066_v37 = vadd.f32 %v188_v54, %v2035_v56  ;;  %v2074_v49 = vadd.f32 %v289_v55, %v2044_v6 }
 0x143   :  { %v2038_v58 = vpop.f32.mrf.mxu1  ;;  %v190_v59 = vpop.f32.mrf.mxu0  ;;  %v1422_v51 = vmul.f32 -1.442695, %v2063_v34 }
 0x144   :  { %1705 = vpow2.f32 %v1446_v57  ;;  %v2078_v52 = vadd.f32 %v190_v59, %v2035_v56  ;;  %v1425_v54 = vmul.f32 -1.442695, %v2066_v37 }
 0x145   :  { %v295_v60 = vpop.f32.mrf.mxu1  ;;  %v194_v8 = vpop.f32.mrf.mxu0 }
 0x146   :  { %v2082_v57 = vadd.f32 %v194_v8, %v2040_v61 }
 0x147   :  { %v1696_v62 = vpop.eup %1695  ;;  %v2042_v63 = vpop.f32.mrf.mxu1 }
 0x148   :  { %v452_v5 = vadd.f32 1.0, %v1696_v62  ;;  %v196_v21 = vpop.f32.mrf.mxu0 }
 0x149   :  { %v1698_v7 = vpop.eup %1697  ;;  %v2046_v13 = vpop.f32.mrf.mxu1  ;;  %v2070_v44 = vadd.f32 %v196_v21, %v2040_v61 }
 0x14a   :  { %v453_v15 = vadd.f32 1.0, %v1698_v7  ;;  %1707 = vrcp.f32 %v452_v5  ;;  %v200_v38 = vpop.f32.mrf.mxu0 }
 0x14b   :  { %v2048_v16 = vpop.f32.mrf.mxu1  ;;  %v1700_v17 = vpop.eup %1699  ;;  %v1430_v7 = vmul.f32 -1.442695, %v2070_v44  ;;  %v2086_v55 = vadd.f32 %v200_v38, %v2021_v43 }
 0x14c   :  { %1709 = vrcp.f32 %v453_v15  ;;  %v456_v20 = vadd.f32 1.0, %v1700_v17  ;;  %v202_v62 = vpop.f32.mrf.mxu0  ;;  %v1419_v15 = vmul.f32 -1.442695, %v2074_v49 }
 0x14d   :  { %v307_v22 = vpop.f32.mrf.mxu1  ;;  %v1702_v23 = vpop.eup %1701  ;;  %v2091_v21 = vadd.f32 %v202_v62, %v2021_v43 }
 0x14e   :  { %1711 = vrcp.f32 %v456_v20  ;;  %v457_v25 = vadd.f32 1.0, %v1702_v23  ;;  %v1426_v20 = vmul.f32 -1.442695, %v2078_v52  ;;  %v1429_v23 = vmul.f32 -1.442695, %v2082_v57 }
 0x14f   :  { %v309_v27 = vpop.f32.mrf.mxu1  ;;  %v1704_v28 = vpop.eup %1703  ;;  %v2100_v38 = vadd.f32 %v307_v22, %v2040_v61 }
 0x150   :  { %1713 = vrcp.f32 %v457_v25  ;;  %v460_v35 = vadd.f32 1.0, %v1704_v28  ;;  %v2095_v25 = vadd.f32 %v295_v60, %v2053_v19  ;;  %v1434_v60 = vmul.f32 -1.442695, %v2091_v21 }
 0x151   :  { %v313_v39 = vpop.f32.mrf.mxu1  ;;  %v1706_v41 = vpop.eup %1705 }
 0x152   :  { %1715 = vrcp.f32 %v460_v35  ;;  %v461_v47 = vadd.f32 1.0, %v1706_v41  ;;  %v1433_v35 = vmul.f32 -1.442695, %v2086_v55 }
 0x153   :  { %v315_v50 = vpop.f32.mrf.mxu1  ;;  %1717 = vpow2.f32 %v1417_v31 }
 0x154   :  { %1719 = vrcp.f32 %v461_v47  ;;  %v2112_v22 = vadd.f32 %v315_v50, %v2021_v43 }
 0x155   :  { %v319_v5 = vpop.f32.mrf.mxu1  ;;  %1721 = vpow2.f32 %v1418_v42  ;;  %v2104_v42 = vadd.f32 %v309_v27, %v2040_v61  ;;  %v1431_v61 = vmul.f32 -1.442695, %v2100_v38 }
 0x156   :  { %1723 = vpow2.f32 %v1421_v46  ;;  %v2116_v27 = vadd.f32 %v319_v5, %v2006_v30 }
 0x157   :  { %v321_v17 = vpop.f32.mrf.mxu1  ;;  %v1708_v59 = vpop.eup %1707  ;;  %1725 = vpow2.f32 %v1422_v51  ;;  %v2108_v51 = vadd.f32 %v313_v39, %v2021_v43  ;;  %v1432_v39 = vmul.f32 -1.442695, %v2104_v42 }
 0x158   :  { %1727 = vpow2.f32 %v1425_v54  ;;  %v548_v41 = vmul.f32 %v1708_v59, %v2011_v33 }
 0x159   :  { %v1710_v8 = vpop.eup %1709  ;;  %v325_v28 = vpop.f32.mrf.mxu1  ;;  %1729 = vpow2.f32 %v1430_v7  ;;  %v1435_v50 = vmul.f32 -1.442695, %v2108_v51 }
 0x15a   :  { %v549_v31 = vmul.f32 %v1710_v8, %v2015_v36  ;;  %1731 = vpow2.f32 %v1419_v15  ;;  %v1423_v36 = vmul.f32 -1.442695, %v2095_v25  ;;  %v2122_v15 = vadd.f32 %v321_v17, %v2006_v30 }
 0x15b   :  { %v327_v46 = vpop.f32.mrf.mxu1  ;;  %v1712_v47 = vpop.eup %1711  ;;  %1733 = vpow2.f32 %v1426_v20  ;;  %v2126_v20 = vadd.f32 %v325_v28, %v2004_v29  ;;  %v2136_v17 = vadd.f32 %v2042_v63, %v2053_v19  ;;  %v1439_v28 = vmul.f32 -1.442695, %v2116_v27 }
 0x15c   :  { %1735 = vpow2.f32 %v1429_v23  ;;  %v575_v54 = vadd.f32 %v549_v31, %v548_v41  ;;  %v552_v62 = vmul.f32 %v1712_v47, %v2019_v40  ;;  %v1436_v40 = vmul.f32 -1.442695, %v2112_v22 }
 0x15d   :  { %v1714_v33 = vpop.eup %1713  ;;  %1737 = vpow2.f32 %v1433_v35  ;;  %v331_v59 = vpop.f32.mrf.mxu1  ;;  %v2140_v23 = vadd.f32 %v2046_v13, %v2035_v56  ;;  %v1440_v41 = vmul.f32 -1.442695, %v2122_v15  ;;  %v2152_v13 = vadd.f32 %v2048_v16, %v2035_v56 }
 0x15e   :  { %v553_v7 = vmul.f32 %v1714_v33, %v2025_v45  ;;  %576 = vadd.xlane.f32.xlu1 %v575_v54  ;;  %1739 = vpow2.f32 %v1434_v60  ;;  %v2132_v45 = vadd.f32 %v327_v46, %v2004_v29  ;;  %v1443_v19 = vmul.f32 -1.442695, %v2126_v20 }
 0x15f   :  { %v1716_v43 = vpop.eup %1715  ;;  %1741 = vpow2.f32 %v1423_v36  ;;  %v333_v46 = vpop.f32.mrf.mxu1  ;;  %v1424_v54 = vmul.f32 -1.442695, %v2136_v17  ;;  %v2163_v56 = vadd.f32 %v331_v59, %v2008_v32 }
 0x160   :  { %v2128_v5 = vpop.eup %1717  ;;  %v578_v8 = vadd.f32 %v553_v7, %v552_v62  ;;  %1743 = vpow2.f32 %v1431_v61  ;;  %v556_v35 = vmul.f32 %v1716_v43, %v2028_v48  ;;  %v1444_v48 = vmul.f32 -1.442695, %v2132_v45 }
 0x161   :  { %v1720_v30 = vpop.eup %1719  ;;  %1745 = vpow2.f32 %v1432_v39  ;;  %v1544_v60 = vpop.f32.mrf.mxu1  ;;  %v1427_v61 = vmul.f32 -1.442695, %v2140_v23  ;;  %v1428_v62 = vmul.f32 -1.442695, %v2152_v13  ;;  %v2169_v43 = vadd.f32 %v333_v46, %v2008_v32 }
 0x162   :  { %v2143_v31 = vpop.eup %1721  ;;  %v557_v29 = vmul.f32 %v1720_v30, %v2033_v53  ;;  %579 = vadd.xlane.f32.xlu1 %v578_v8  ;;  %1747 = vpow2.f32 %v1435_v50  ;;  %v1447_v59 = vmul.f32 -1.442695, %v2163_v56 }
 0x163   :  { %v2148_v63 = vpop.eup %1723  ;;  %1749 = vpow2.f32 %v1436_v40  ;;  %v2171_v50 = vpop.f32.mrf.mxu1 }
 0x164   :  { %v2155_v47 = vpop.eup %1725  ;;  %v581_v53 = vadd.f32 %v557_v29, %v556_v35  ;;  %1751 = vpow2.f32 %v1439_v28  ;;  %2496 = vst [vmem:[#allocation3_spill] sm:$0xff] %v2171_v50  ;;  %v1448_v35 = vmul.f32 -1.442695, %v2169_v43  ;;  %v652_v29 = vpop.permute.xlu1 %651 }
 0x165   :  { %v2158_v36 = vpop.eup %1727  ;;  %1753 = vpow2.f32 %v1440_v41  ;;  %v1547_v41 = vpop.f32.mrf.mxu1 }
 0x166   :  { %v1730_v33 = vpop.eup %1729  ;;  %582 = vadd.xlane.f32.xlu1 %v581_v53  ;;  %1755 = vpow2.f32 %v1443_v19 }
 0x167   :  { %v2165_v16 = vpop.eup %1731  ;;  %v445_v39 = vadd.f32 1.0, %v1730_v33  ;;  %1757 = vpow2.f32 %v1444_v48  ;;  %v657_v48 = vpop.permute.xlu0 %656 }
 0x168   :  { %v1734_v7 = vpop.eup %1733  ;;  %1759 = vpow2.f32 %v1424_v54  ;;  %v2177_v14 = vadd.f32 %v1547_v41, %v657_v48 }
 0x169   :  { %v1736_v40 = vpop.eup %1735  ;;  %1761 = vpow2.f32 %v1427_v61 }
 0x16a   :  { %v1738_v8 = vpop.eup %1737  ;;  %1763 = vpow2.f32 %v1428_v62  ;;  %v756_v62 = vpop.f32.mrf.mxu1  ;;  %v444_v48 = vadd.f32 1.0, %v1736_v40  ;;  %v440_v40 = vadd.f32 1.0, %v2158_v36 }
 0x16b   :  { %v448_v30 = vadd.f32 1.0, %v1738_v8  ;;  %v1740_v28 = vpop.eup %1739  ;;  %1765 = vrcp.f32 %v445_v39  ;;  %v2179_v10 = vadd.f32 %v756_v62, %v652_v29  ;;  %v441_v62 = vadd.f32 1.0, %v1734_v7 }
 0x16c   :  { %v2175_v19 = vpop.eup %1741  ;;  %v449_v32 = vadd.f32 1.0, %v1740_v28 }
 0x16d   :  { %1767 = vrcp.f32 %v448_v30  ;;  %v1744_v46 = vpop.eup %1743  ;;  %v647_v30 = vpop.permute.xlu1 %646 }
 0x16e   :  { %1769 = vpow2.f32 %v1447_v59  ;;  %v1746_v53 = vpop.eup %1745  ;;  %v446_v54 = vadd.f32 1.0, %v1744_v46 }
 0x16f   :  { %1771 = vrcp.f32 %v449_v32  ;;  %v1748_v33 = vpop.eup %1747  ;;  %v447_v61 = vadd.f32 1.0, %v1746_v53 }
 0x170   :  { %1773 = vpow2.f32 %v1448_v35  ;;  %v1750_v8 = vpop.eup %1749  ;;  %v450_v39 = vadd.f32 1.0, %v1748_v33  ;;  %v2182_v33 = vadd.f32 %v1544_v60, %v647_v30 }
 0x171   :  { %1775 = vrcp.f32 %v446_v54  ;;  %v1752_v2 = vpop.eup %1751  ;;  %v451_v50 = vadd.f32 1.0, %v1750_v8  ;;  %v1457_v54 = vmul.f32 -1.442695, %v2177_v14 }
 0x172   :  { %1777 = vrcp.f32 %v447_v61  ;;  %v1754_v28 = vpop.eup %1753  ;;  %v454_v59 = vadd.f32 1.0, %v1752_v2  ;;  %v2188_v2 = vadd.f32 %v2038_v58, %v2044_v6  ;;  %v1455_v60 = vmul.f32 -1.442695, %v2182_v33 }
 0x173   :  { %1779 = vrcp.f32 %v450_v39  ;;  %v1756_v32 = vpop.eup %1755  ;;  %v455_v46 = vadd.f32 1.0, %v1754_v28 }
 0x174   :  { %1781 = vrcp.f32 %v451_v50  ;;  %v1758_v53 = vpop.eup %1757  ;;  %v458_v35 = vadd.f32 1.0, %v1756_v32  ;;  %v1456_v50 = vmul.f32 -1.442695, %v2179_v10 }
 0x175   :  { %1783 = vrcp.f32 %v454_v59  ;;  %v2184_v41 = vpop.eup %1759  ;;  %v459_v61 = vadd.f32 1.0, %v1758_v53  ;;  %v1420_v59 = vmul.f32 -1.442695, %v2188_v2 }
 0x176   :  { %1785 = vrcp.f32 %v455_v46  ;;  %v1762_v8 = vpop.eup %1761 }
 0x177   :  { %1787 = vrcp.f32 %v458_v35  ;;  %v1764_v29 = vpop.eup %1763  ;;  %v442_v7 = vadd.f32 1.0, %v1762_v8 }
 0x178   :  { %1789 = vrcp.f32 %v459_v61  ;;  %v1766_v39 = vpop.eup %1765  ;;  %v443_v6 = vadd.f32 1.0, %v1764_v29 }
 0x179   :  { %1791 = vpow2.f32 %v1457_v54 }
 0x17a   :  { %v1768_v30 = vpop.eup %1767  ;;  %1793 = vrcp.f32 %v444_v48 }
 0x17b   :  { %v1770_v28 = vpop.eup %1769  ;;  %1795 = vpow2.f32 %v1456_v50  ;;  %v544_v46 = vmul.f32 %v1768_v30, %v2086_v55 }
 0x17c   :  { %v1772_v58 = vpop.eup %1771  ;;  %1797 = vrcp.f32 %v441_v62 }
 0x17d   :  { %v1774_v32 = vpop.eup %1773  ;;  %v545_v53 = vmul.f32 %v1772_v58, %v2091_v21  ;;  %1799 = vpow2.f32 %v1455_v60  ;;  %v462_v60 = vadd.f32 1.0, %v1770_v28 }
 0x17e   :  { %v1776_v35 = vpop.eup %1775  ;;  %1801 = vrcp.f32 %v440_v40  ;;  %v463_v62 = vadd.f32 1.0, %v1774_v32 }
 0x17f   :  { %v1778_v54 = vpop.eup %1777  ;;  %1803 = vpow2.f32 %v1420_v59  ;;  %v572_v36 = vadd.f32 %v545_v53, %v544_v46  ;;  %v542_v61 = vmul.f32 %v1776_v35, %v2100_v38  ;;  %v437_v59 = vadd.f32 1.0, %v2155_v47 }
 0x180   :  { %v1780_v48 = vpop.eup %1779  ;;  %1805 = vrcp.f32 %v443_v6  ;;  %v543_v50 = vmul.f32 %v1778_v54, %v2104_v42  ;;  %v436_v46 = vadd.f32 1.0, %v2148_v63 }
 0x181   :  { %v1782_v29 = vpop.eup %1781  ;;  %1807 = vrcp.f32 %v442_v7  ;;  %573 = vadd.xlane.f32.xlu0 %v572_v36  ;;  %v546_v8 = vmul.f32 %v1780_v48, %v2108_v51 }
 0x182   :  { %v1784_v55 = vpop.eup %1783  ;;  %v547_v21 = vmul.f32 %v1782_v29, %v2112_v22  ;;  %v2200_v30 = vadd.f32 %v543_v50, %v542_v61  ;;  %1809 = vrcp.f32 %v463_v62 }
 0x183   :  { %v1786_v40 = vpop.eup %1785  ;;  %v550_v38 = vmul.f32 %v1784_v55, %v2116_v27  ;;  %1811 = vrcp.f32 %v462_v60  ;;  %v541_v27 = vmul.f32 %v1766_v39, %v2070_v44  ;;  %v433_v44 = vadd.f32 1.0, %v2143_v31 }
 0x184   :  { %v1788_v58 = vpop.eup %1787  ;;  %v551_v42 = vmul.f32 %v1786_v40, %v2122_v15  ;;  %v604_v6 = vadd.f32 %v547_v21, %v546_v8  ;;  %1813 = vrcp.f32 %v437_v59  ;;  %v439_v15 = vadd.f32 1.0, %v2184_v41 }
 0x185   :  { %v1790_v32 = vpop.eup %1789  ;;  %v554_v51 = vmul.f32 %v1788_v58, %v2126_v20  ;;  %v432_v8 = vadd.f32 1.0, %v2128_v5 }
 0x186   :  { %v1792_v7 = vpop.eup %1791  ;;  %v555_v22 = vmul.f32 %v1790_v32, %v2132_v45  ;;  %605 = vadd.xlane.f32.xlu0 %v604_v6  ;;  %v607_v28 = vadd.f32 %v551_v42, %v550_v38  ;;  %v438_v45 = vadd.f32 1.0, %v2175_v19 }
 0x187   :  { %v1794_v53 = vpop.eup %1793  ;;  %v780_v47 = vadd.f32 1.0, %v1792_v7 }
 0x188   :  { %v1796_v35 = vpop.eup %1795  ;;  %v610_v54 = vadd.f32 %v555_v22, %v554_v51  ;;  %v540_v20 = vmul.f32 %v1794_v53, %v2082_v57 }
 0x189   :  { %v1798_v36 = vpop.eup %1797  ;;  %1815 = vrcp.f32 %v780_v47  ;;  %v779_v63 = vadd.f32 1.0, %v1796_v35 }
 0x18a   :  { %v1800_v48 = vpop.eup %1799  ;;  %1817 = vrcp.f32 %v436_v46  ;;  %608 = vadd.xlane.f32.xlu0 %v607_v28  ;;  %611 = vadd.xlane.f32.xlu1 %v610_v54  ;;  %v537_v41 = vmul.f32 %v1798_v36, %v2078_v52  ;;  %v569_v39 = vadd.f32 %v541_v27, %v540_v20  ;;  %v434_v52 = vadd.f32 1.0, %v2165_v16  ;;  %v2267_v20 = vld [vmem:[%s2486_s2 + $0x48] sm:$0xff] }
 0x18b   :  { %v1802_v61 = vpop.eup %1801  ;;  %1819 = vrcp.f32 %v779_v63  ;;  %v778_v50 = vadd.f32 1.0, %v1800_v48  ;;  %v2260_v63 = vld [vmem:[%s2486_s2 + $0x40] sm:$0xff] }
 0x18c   :  { %v1804_v62 = vpop.eup %1803  ;;  %1821 = vrcp.f32 %v439_v15  ;;  %v536_v57 = vmul.f32 %v1802_v61, %v2066_v37 }
 0x18d   :  { %v1806_v29 = vpop.eup %1805  ;;  %1823 = vrcp.f32 %v778_v50  ;;  %v435_v19 = vadd.f32 1.0, %v1804_v62  ;;  %v2277_v50 = vld [vmem:[%s2486_s2 + $0x70] sm:$0xff] }
 0x18e   :  { %v1808_v55 = vpop.eup %1807  ;;  %1825 = vrcp.f32 %v438_v45  ;;  %570 = vadd.xlane.f32.xlu0 %v569_v39  ;;  %v539_v21 = vmul.f32 %v1806_v29, %v2152_v13  ;;  %v566_v60 = vadd.f32 %v537_v41, %v536_v57  ;;  %v2499_v39 = vld [vmem:[#allocation3_spill] sm:$0xff] }
 0x18f   :  { %1827 = vrcp.f32 %v433_v44  ;;  %v1810_v40 = vpop.eup %1809  ;;  %v538_v31 = vmul.f32 %v1808_v55, %v2140_v23 }
 0x190   :  { %1829 = vrcp.f32 %v432_v8  ;;  %v1812_v59 = vpop.eup %1811  ;;  %v559_v5 = vmul.f32 %v1810_v40, %v2169_v43 }
 0x191   :  { %1831 = vrcp.f32 %v435_v19  ;;  %v598_v58 = vadd.f32 %v539_v21, %v538_v31  ;;  %v1814_v37 = vpop.eup %1813  ;;  %v558_v42 = vmul.f32 %v1812_v59, %v2163_v56 }
 0x192   :  { %567 = vadd.xlane.f32.xlu0 %v566_v60  ;;  %1833 = vrcp.f32 %v434_v52  ;;  %v533_v16 = vmul.f32 %v1814_v37, %v2063_v34 }
 0x193   :  { %v613_v46 = vadd.f32 %v559_v5, %v558_v42 }
 0x196   :  { %v1816_v38 = vpop.eup %1815  ;;  %599 = vadd.xlane.f32.xlu0 %v598_v58 }
 0x197   :  { %v1818_v13 = vpop.eup %1817  ;;  %v792_v6 = vmul.f32 %v1816_v38, %v2177_v14 }
 0x198   :  { %v1820_v32 = vpop.eup %1819  ;;  %v532_v43 = vmul.f32 %v1818_v13, %v2059_v26 }
 0x199   :  { %v1822_v23 = vpop.eup %1821  ;;  %v791_v7 = vmul.f32 %v1820_v32, %v2179_v10  ;;  %1548 = vmatprep.subr.mxu1 %v792_v6 }
 0x19a   :  { %v1824_v51 = vpop.eup %1823  ;;  %614 = vadd.xlane.f32.xlu0 %v613_v46  ;;  %1549 = vmatpush3.msra.mxu1 %v792_v6  ;;  %v535_v14 = vmul.f32 %v1822_v23, %v2136_v17  ;;  %v563_v28 = vadd.f32 %v533_v16, %v532_v43 }
 0x19b   :  { %v1826_v22 = vpop.eup %1825  ;;  %641 = vperm.xlu1 %1685, %v1908_v4   ;;  %v790_v56 = vmul.f32 %v1824_v51, %v2182_v33  ;;  %1550 = vmatprep.subr.mxu1 %v791_v7 }
 0x19c   :  { %1551 = vmatpush3.msra.mxu1 %v791_v7  ;;  %v1828_v34 = vpop.eup %1827  ;;  %v534_v10 = vmul.f32 %v1826_v22, %v2095_v25  ;;  %v2243_v25 = vld [vmem:[%s2486_s2 + $0x60] sm:$0xf] }
 0x19d   :  { %1552 = vmatprep.subr.mxu1 %v790_v56  ;;  %v1830_v53 = vpop.eup %1829  ;;  %v529_v26 = vmul.f32 %v1828_v34, %v2056_v24  ;;  %v2497_v24 = vmov 0.0  }
 0x19e   :  { %564 = vadd.xlane.f32.xlu0 %v563_v28  ;;  %1553 = vmatpush3.msra.mxu1 %v790_v56  ;;  %v595_v47 = vadd.f32 %v535_v14, %v534_v10  ;;  %v1832_v35 = vpop.eup %1831  ;;  %v528_v27 = vmul.f32 %v1830_v53, %v2051_v18  ;;  %v1862_v18 = vmov 113   ;;  %1387 = vst [vmem:[%s2489_s3] sm:$0xff] %v2497_v24  ;;  %1388 = vst [vmem:[%s2489_s3 + $0x8] sm:$0xff] %v2497_v24 }
 0x19f   :  { %v1834_v33 = vpop.eup %1833  ;;  %v531_v15 = vmul.f32 %v1832_v35, %v2188_v2  ;;  %1575 = vmatprep.mubr.msk.f32.mxu0 %vm1861_vm4, %v2497_v24  ;;  %1687 = vset.pattern.permute.xlu1 %v1862_v18  ;;  %v2249_v2 = vld [vmem:[%s2486_s2 + $0x58] sm:$0xff] }
 0x1a0   :  { %v560_v17 = vadd.f32 %v529_v26, %v528_v27  ;;  %v530_v54 = vmul.f32 %v1834_v33, %v2074_v49  ;;  %1686 = vset.pattern.permute.xlu0 %v1862_v18  ;;  %v1863_v49 = vmov 64   ;;  %v1850_v18 = vld [vmem:[%s2486_s2 + $0x18] sm:$0xff] }
 0x1a2   :  { %596 = vadd.xlane.f32.xlu0 %v595_v47  ;;  %v592_v36 = vadd.f32 %v531_v15, %v530_v54  ;;  %v1848_v54 = vld [vmem:[%s2486_s2 + $0x8] sm:$0xff] }
 0x1a6   :  { %561 = vadd.xlane.f32.xlu0 %v560_v17  ;;  %v1847_v17 = vld [vmem:[%s2486_s2] sm:$0xff] }
 0x1aa   :  { %593 = vadd.xlane.f32.xlu0 %v592_v36  ;;  %v1849_v36 = vld [vmem:[%s2486_s2 + $0x10] sm:$0xff] }
 0x1bf   :  { %602 = vadd.xlane.f32.xlu1 %v2200_v30  ;;  %v2255_v30 = vld [vmem:[%s2486_s2 + $0x50] sm:$0xff] }
 0x1c0   :  { %805 = vrot.lane.b32.xlu0 %v1908_v4, %s1860_s1 }
 0x1c4   :  { %802 = vperm.xlu0 %1686, %v1921_v9  }
 0x1c8   :  { %1689 = vset.pattern.permute.xlu0 %v1863_v49 }
 0x1c9   :  { %973 = vperm.xlu0 %1689, %v2249_v2  }
 0x1cd   :  { %958 = vperm.xlu0 %1689, %v2260_v63  }
 0x1d0   :  { %807 = vrot.lane.b32.xlu1 %v1921_v9, %s1860_s1 }
 0x1d1   :  { %948 = vperm.xlu0 %1689, %v1903_v3  }
 0x1d4   :  { %797 = vperm.xlu1 %1687, %v1908_v4  }
 0x1d5   :  { %938 = vperm.xlu0 %1689, %v1944_v12   ;;  %v2498_v12 = vld [vmem:[#allocation2_spill] sm:$0xff] }
 0x1d8   :  { %1688 = vset.pattern.permute.xlu1 %v1863_v49  ;;  %v1851_v49 = vld [vmem:[%s2486_s2 + $0x20] sm:$0xff] }
 0x1d9   :  { %978 = vperm.xlu1 %1688, %v2243_v25   ;;  %933 = vperm.xlu0 %1689, %v1939_v11   ;;  %v2500_v11 = vmov 80  }
 0x1dd   :  { %968 = vperm.xlu1 %1688, %v2255_v30   ;;  %923 = vperm.xlu0 %1689, %v1921_v9  }
 0x1e1   :  { %963 = vperm.xlu1 %1688, %v2267_v20  }
 0x1e5   :  { %953 = vperm.xlu1 %1688, %v1889_v0  }
 0x1e7   :  { %v577_v48 = vpop.xlane.xlu1 %576 }
 0x1e8   :  { %v589_v59 = vmul.f32 0.00390625, %v577_v48  ;;  %v1852_v48 = vld [vmem:[%s2486_s2 + $0x28] sm:$0xff] }
 0x1e9   :  { %943 = vperm.xlu1 %1688, %v1894_v1  }
 0x1eb   :  { %v580_v45 = vpop.xlane.xlu1 %579 }
 0x1ec   :  { %v590_v40 = vmul.f32 0.00390625, %v580_v45  ;;  %v1853_v45 = vld [vmem:[%s2486_s2 + $0x30] sm:$0xff] }
 0x1ed   :  { %1235 = vrot.lane.b32.xlu1 %v2277_v50, %s1864_s22 }
 0x1ef   :  { %v583_v62 = vpop.xlane.xlu1 %582 }
 0x1f0   :  { %v591_v9 = vmul.f32 0.00390625, %v583_v62 }
 0x1f1   :  { %928 = vperm.xlu1 %1688, %v2498_v12  }
 0x1f5   :  { %918 = vperm.xlu1 %1688, %v1908_v4  }
 0x1f9   :  { %1691 = vset.pattern.permute.xlu1 %v2500_v11 }
 0x1fa   :  { %1383 = vperm.xlu1 %1691, %v2277_v50  }
 0x20a   :  { %v574_v61 = vpop.xlane.xlu0 %573 }
 0x20b   :  { %v588_v38 = vmul.f32 0.00390625, %v574_v61  ;;  %v1854_v61 = vld [vmem:[%s2486_s2 + $0x38] sm:$0xff] }
 0x20f   :  { %v606_v44 = vpop.xlane.xlu0 %605 }
 0x210   :  { %v620_v5 = vmul.f32 0.00390625, %v606_v44 }
 0x212   :  { %v2303_v32 = vsel %vm624_vm5, %v588_v38, %v620_v5 }
 0x213   :  { %v609_v0 = vpop.xlane.xlu0 %608  ;;  %v612_v3 = vpop.xlane.xlu1 %611 }
 0x214   :  { %v622_v21 = vmul.f32 0.00390625, %v612_v3  ;;  %v621_v52 = vmul.f32 0.00390625, %v609_v0 }
 0x216   :  { %v2293_v58 = vsel %vm624_vm5, %v590_v40, %v622_v21  ;;  %v2298_v13 = vsel %vm624_vm5, %v589_v59, %v621_v52 }
 0x217   :  { %v571_v41 = vpop.xlane.xlu0 %570  ;;  %v642_v1 = vpop.permute.xlu1 %641 }
 0x218   :  { %v747_v29 = vadd.f32 %v2499_v39, %v642_v1  ;;  %v587_v22 = vmul.f32 0.00390625, %v571_v41 }
 0x21a   :  { %v1454_v55 = vmul.f32 -1.442695, %v747_v29 }
 0x21b   :  { %v568_v8 = vpop.xlane.xlu0 %567 }
 0x21c   :  { %1835 = vpow2.f32 %v1454_v55  ;;  %v586_v28 = vmul.f32 0.00390625, %v568_v8 }
 0x21f   :  { %v600_v57 = vpop.xlane.xlu0 %599 }
 0x220   :  { %v618_v56 = vmul.f32 0.00390625, %v600_v57 }
 0x222   :  { %v2316_v35 = vsel %vm624_vm5, %v586_v28, %v618_v56 }
 0x223   :  { %v615_v19 = vpop.xlane.xlu0 %614 }
 0x224   :  { %v623_v60 = vmul.f32 0.00390625, %v615_v19 }
 0x226   :  { %v2288_v31 = vsel %vm624_vm5, %v591_v9, %v623_v60 }
 0x227   :  { %1560 = vmatpush3.msra.mxu0 %v2288_v31  ;;  %v565_v4 = vpop.xlane.xlu0 %564 }
 0x228   :  { %1561 = vmatprep.subr.mxu0 %v2497_v24  ;;  %v585_v26 = vmul.f32 0.00390625, %v565_v4 }
 0x229   :  { %v1836_v37 = vpop.eup %1835  ;;  %1562 = vmatpush3.msra.mxu0 %v2293_v58 }
 0x22a   :  { %v777_v42 = vadd.f32 1.0, %v1836_v37  ;;  %1563 = vmatprep.subr.mxu0 %v2497_v24 }
 0x22b   :  { %1564 = vmatpush3.msra.mxu0 %v2298_v13  ;;  %v597_v6 = vpop.xlane.xlu0 %596 }
 0x22c   :  { %1837 = vrcp.f32 %v777_v42  ;;  %1565 = vmatprep.subr.mxu0 %v2497_v24  ;;  %v617_v34 = vmul.f32 0.00390625, %v597_v6 }
 0x22d   :  { %1566 = vmatpush3.msra.mxu0 %v2303_v32 }
 0x22e   :  { %1567 = vmatprep.subr.mxu0 %v2497_v24  ;;  %v2323_v33 = vsel %vm624_vm5, %v585_v26, %v617_v34 }
 0x22f   :  { %v562_v16 = vpop.xlane.xlu0 %561 }
 0x230   :  { %v584_v27 = vmul.f32 0.00390625, %v562_v16 }
 0x233   :  { %v594_v46 = vpop.xlane.xlu0 %593 }
 0x234   :  { %v616_v47 = vmul.f32 0.00390625, %v594_v46 }
 0x236   :  { %v2328_v15 = vsel %vm624_vm5, %v584_v27, %v616_v47 }
 0x237   :  { %v806_v23 = vpop.permute.xlu0 %805 }
 0x238   :  { %1556 = vmatprep.mubr.msk.f32.mxu1 %vm809_vm6, %v806_v23 }
 0x239   :  { %v1838_v7 = vpop.eup %1837 }
 0x23a   :  { %v789_v51 = vmul.f32 %v1838_v7, %v747_v29 }
 0x23c   :  { %1554 = vmatprep.subr.mxu1 %v789_v51 }
 0x23d   :  { %1555 = vmatpush3.msra.mxu1 %v789_v51 }
 0x23e   :  { %1643 = vmatprep.subr.mxu1 %v2497_v24 }
 0x248   :  { %v603_v43 = vpop.xlane.xlu1 %602 }
 0x249   :  { %v619_v14 = vmul.f32 0.00390625, %v603_v43 }
 0x24b   :  { %v2310_v10 = vsel %vm624_vm5, %v587_v22, %v619_v14 }
 0x24c   :  { %v808_v53 = vpop.permute.xlu1 %807  ;;  %1568 = vmatpush3.msra.mxu0 %v2310_v10 }
 0x24d   :  { %1557 = vmatmul.mubr.msk.f32.vlgmr.msra.gmra.mxu1 %vm809_vm6, %v808_v53  ;;  %1569 = vmatprep.subr.mxu0 %v2497_v24 }
 0x24e   :  { %1570 = vmatpush3.msra.mxu0 %v2316_v35  ;;  %1647 = vmatprep.mubr.msk.f32.mxu1 %vm1861_vm4, %v2497_v24 }
 0x24f   :  { %1571 = vmatprep.subr.mxu0 %v2497_v24 }
 0x250   :  { %1572 = vmatpush3.msra.mxu0 %v2323_v33  ;;  %v798_v44 = vpop.permute.xlu1 %797 }
 0x251   :  { %1573 = vmatprep.subr.mxu0 %v2497_v24 }
 0x252   :  { %1574 = vmatpush3.msra.mxu0 %v2328_v15 }
 0x253   :  { %1576 = vmatmul.mubr.msk.f32.vlgmr.msra.gmra.mxu0 %vm981_vm7, %v1847_v17  ;;  %1614 = vmatprep.subr.mxu0 %v2497_v24 }
 0x254   :  { %1578 = vmatprep.mubr.msk.f32.mxu0 %vm1861_vm4, %v2497_v24  ;;  %v2409_v39 = vpop.permute.xlu1 %978 }
 0x257   :  { %1579 = vmatmul.mubr.msk.f32.gmra.mxu0 %vm981_vm7, %v1848_v54 }
 0x258   :  { %1581 = vmatprep.mubr.msk.f32.mxu0 %vm1861_vm4, %v2497_v24 }
 0x25b   :  { %1582 = vmatmul.mubr.msk.f32.gmra.mxu0 %vm981_vm7, %v1849_v36 }
 0x25c   :  { %1584 = vmatprep.mubr.msk.f32.mxu0 %vm1861_vm4, %v2497_v24 }
 0x25f   :  { %1585 = vmatmul.mubr.msk.f32.gmra.mxu0 %vm981_vm7, %v1850_v18 }
 0x260   :  { %1587 = vmatprep.mubr.msk.f32.mxu0 %vm1861_vm4, %v2497_v24 }
 0x263   :  { %1588 = vmatmul.mubr.msk.f32.gmra.mxu0 %vm981_vm7, %v1851_v49 }
 0x264   :  { %1590 = vmatprep.mubr.msk.f32.mxu0 %vm1861_vm4, %v2497_v24 }
 0x267   :  { %1591 = vmatmul.mubr.msk.f32.gmra.mxu0 %vm981_vm7, %v1852_v48 }
 0x268   :  { %1593 = vmatprep.mubr.msk.f32.mxu0 %vm1861_vm4, %v2497_v24 }
 0x26b   :  { %1594 = vmatmul.mubr.msk.f32.gmra.mxu0 %vm981_vm7, %v1853_v45 }
 0x26c   :  { %1596 = vmatprep.mubr.msk.f32.mxu0 %vm1861_vm4, %v2497_v24 }
 0x26f   :  { %1597 = vmatmul.mubr.msk.f32.gmra.mxu0 %vm981_vm7, %v1854_v61 }
 0x270   :  { %1599 = vmatprep.mubr.msk.f32.mxu0 %vm1861_vm4, %v2497_v24 }
 0x273   :  { %1600 = vmatmul.mubr.msk.f32.gmra.mxu0 %vm981_vm7, %v2260_v63  ;;  %v2403_v63 = vld [vmem:[%s2486_s2 + $0x68] sm:$0xf] }
 0x274   :  { %1602 = vmatprep.mubr.msk.f32.mxu0 %vm1861_vm4, %v2497_v24 }
 0x277   :  { %1603 = vmatmul.mubr.msk.f32.gmra.mxu0 %vm981_vm7, %v2267_v20 }
 0x278   :  { %1605 = vmatprep.mubr.msk.f32.mxu0 %vm1861_vm4, %v2497_v24 }
 0x27b   :  { %1606 = vmatmul.mubr.msk.f32.gmra.mxu0 %vm981_vm7, %v2255_v30  ;;  %v1865_v30 = vmov 100  }
 0x27c   :  { %1608 = vmatprep.mubr.msk.f32.mxu0 %vm1861_vm4, %v2497_v24  ;;  %1690 = vset.pattern.permute.xlu0 %v1865_v30 }
 0x27d   :  { %1154 = vperm.xlu0 %1690, %v2403_v63  }
 0x27f   :  { %1609 = vmatmul.mubr.msk.f32.gmra.mxu0 %vm981_vm7, %v2249_v2  ;;  %v803_v2 = vpop.permute.xlu0 %802 }
 0x280   :  { %1611 = vmatprep.mubr.msk.f32.mxu0 %vm1861_vm4, %v2497_v24 }
 0x281   :  { %1692 = vset.pattern.permute.xlu0 %v2500_v11  ;;  %v2415_v11 = vpop.permute.xlu1 %968 }
 0x283   :  { %1612 = vmatmul.mubr.msk.f32.gmra.mxu0 %vm981_vm7, %v2243_v25  ;;  %v974_v53 = vpop.permute.xlu0 %973 }
 0x284   :  { %1640 = vmatprep.mubr.msk.f32.mxu0 %vm1861_vm4, %v2497_v24 }
 0x285   :  { %v964_v52 = vpop.permute.xlu1 %963 }
 0x289   :  { %v954_v38 = vpop.permute.xlu1 %953 }
 0x28d   :  { %v2425_v46 = vpop.permute.xlu1 %943 }
 0x291   :  { %v1236_v28 = vpop.permute.xlu1 %1235 }
 0x30d   :  { %v1558_v20 = vpop.f32.mrf.mxu1 }
 0x30e   :  { %v886_v62 = vadd.f32 %v1558_v20, %v803_v2 }
 0x30f   :  { %v880_v0 = vpop.f32.mrf.mxu1 }
 0x310   :  { %v1461_v25 = vmul.f32 -1.442695, %v886_v62  ;;  %v881_v3 = vadd.f32 %v880_v0, %v798_v44 }
 0x312   :  { %1839 = vpow2.f32 %v1461_v25  ;;  %v1460_v12 = vmul.f32 -1.442695, %v881_v3  ;;  %v929_v25 = vpop.permute.xlu1 %928 }
 0x313   :  { %v2407_v41 = vpop.f32.mrf.mxu0 }
 0x314   :  { %1841 = vpow2.f32 %v1460_v12 }
 0x315   :  { %v1577_v1 = vpop.f32.mrf.mxu0 }
 0x317   :  { %v2411_v29 = vpop.f32.mrf.mxu0 }
 0x319   :  { %v1580_v55 = vpop.f32.mrf.mxu0 }
 0x31b   :  { %v2413_v8 = vpop.f32.mrf.mxu0 }
 0x31d   :  { %v1583_v57 = vpop.f32.mrf.mxu0 }
 0x31f   :  { %v1840_v19 = vpop.eup %1839  ;;  %v2417_v9 = vpop.f32.mrf.mxu0 }
 0x320   :  { %v896_v21 = vadd.f32 1.0, %v1840_v19  ;;  %v919_v19 = vpop.permute.xlu1 %918 }
 0x321   :  { %v1842_v60 = vpop.eup %1841  ;;  %v1586_v40 = vpop.f32.mrf.mxu0 }
 0x322   :  { %1843 = vrcp.f32 %v896_v21  ;;  %v895_v4 = vadd.f32 1.0, %v1842_v60 }
 0x323   :  { %v2419_v59 = vpop.f32.mrf.mxu0 }
 0x324   :  { %1845 = vrcp.f32 %v895_v4 }
 0x325   :  { %v1589_v5 = vpop.f32.mrf.mxu0 }
 0x327   :  { %v2421_v37 = vpop.f32.mrf.mxu0 }
 0x328   :  { %v1100_v44 = vadd.f32 %v2421_v37, %v2425_v46 }
 0x329   :  { %v1592_v42 = vpop.f32.mrf.mxu0 }
 0x32b   :  { %v2423_v6 = vpop.f32.mrf.mxu0 }
 0x32d   :  { %v1595_v16 = vpop.f32.mrf.mxu0 }
 0x32f   :  { %v1844_v23 = vpop.eup %1843  ;;  %v1109_v7 = vpop.f32.mrf.mxu0 }
 0x330   :  { %v902_v51 = vmul.f32 %v1844_v23, %v886_v62 }
 0x331   :  { %v1846_v43 = vpop.eup %1845  ;;  %v1598_v22 = vpop.f32.mrf.mxu0 }
 0x332   :  { %v901_v56 = vmul.f32 %v1846_v43, %v881_v3  ;;  %1644 = vmatpush3.msra.mxu1 %v902_v51 }
 0x333   :  { %v1114_v14 = vpop.f32.mrf.mxu0  ;;  %1645 = vmatprep.subr.mxu1 %v2497_v24 }
 0x334   :  { %1646 = vmatpush3.msra.mxu1 %v901_v56 }
 0x335   :  { %v1601_v34 = vpop.f32.mrf.mxu0  ;;  %1650 = vmatprep.subr.mxu1 %v2497_v24  ;;  %1648 = vmatmul.mubr.msk.f32.vlgmr.msra.gmra.mxu1 %vm1237_vm8, %v1236_v28 }
 0x336   :  { %1651 = vmatpush3.msra.mxu1 %v2288_v31  ;;  %1666 = vmatprep.mubr.msk.f32.mxu1 %vm1861_vm4, %v2497_v24  ;;  %v959_v31 = vpop.permute.xlu0 %958 }
 0x337   :  { %v1119_v26 = vpop.f32.mrf.mxu0  ;;  %1652 = vmatprep.subr.mxu1 %v2497_v24  ;;  %v1115_v61 = vadd.f32 %v1114_v14, %v959_v31 }
 0x338   :  { %1653 = vmatpush3.msra.mxu1 %v2293_v58  ;;  %v1120_v48 = vadd.f32 %v1119_v26, %v964_v52 }
 0x339   :  { %v1604_v47 = vpop.f32.mrf.mxu0  ;;  %1654 = vmatprep.subr.mxu1 %v2497_v24  ;;  %v1146_v20 = vmax.f32 %v1115_v61, 0.0 }
 0x33a   :  { %1655 = vmatpush3.msra.mxu1 %v2298_v13  ;;  %v949_v13 = vpop.permute.xlu0 %948  ;;  %v1147_v2 = vmax.f32 %v1120_v48, 0.0 }
 0x33b   :  { %v1124_v27 = vpop.f32.mrf.mxu0  ;;  %1656 = vmatprep.subr.mxu1 %v2497_v24 }
 0x33c   :  { %1657 = vmatpush3.msra.mxu1 %v2303_v32 }
 0x33d   :  { %v1607_v17 = vpop.f32.mrf.mxu0  ;;  %1658 = vmatprep.subr.mxu1 %v2497_v24 }
 0x33e   :  { %1659 = vmatpush3.msra.mxu1 %v2310_v10 }
 0x33f   :  { %v1129_v54 = vpop.f32.mrf.mxu0  ;;  %1660 = vmatprep.subr.mxu1 %v2497_v24 }
 0x340   :  { %1661 = vmatpush3.msra.mxu1 %v2316_v35  ;;  %v1130_v32 = vadd.f32 %v1129_v54, %v974_v53  ;;  %v1125_v35 = vadd.f32 %v1124_v27, %v2415_v11  ;;  %v1085_v11 = vadd.f32 %v2413_v8, %v929_v25 }
 0x341   :  { %v1610_v58 = vpop.f32.mrf.mxu0  ;;  %1662 = vmatprep.subr.mxu1 %v2497_v24 }
 0x342   :  { %1663 = vmatpush3.msra.mxu1 %v2323_v33  ;;  %v1149_v45 = vmax.f32 %v1130_v32, 0.0  ;;  %v939_v33 = vpop.permute.xlu0 %938  ;;  %v1148_v30 = vmax.f32 %v1125_v35, 0.0  ;;  %v1140_v40 = vmax.f32 %v1085_v11, 0.0 }
 0x343   :  { %v1134_v36 = vpop.f32.mrf.mxu0  ;;  %1664 = vmatprep.subr.mxu1 %v2497_v24  ;;  %v1095_v3 = vadd.f32 %v2419_v59, %v939_v33  ;;  %v1384_v59 = vpop.permute.xlu1 %1383 }
 0x344   :  { %v1135_v18 = vadd.f32 %v1134_v36, %v2409_v39  ;;  %1665 = vmatpush3.msra.mxu1 %v2328_v15  ;;  %v1110_v15 = vadd.f32 %v1109_v7, %v954_v38  ;;  %v1143_v39 = vmax.f32 %v1100_v44, 0.0 }
 0x345   :  { %v1613_v10 = vpop.f32.mrf.mxu0  ;;  %1667 = vmatmul.mubr.msk.f32.vlgmr.msra.gmra.mxu1 %vm981_vm7, %v2277_v50  ;;  %v1105_v50 = vadd.f32 %v2423_v6, %v949_v13  ;;  %v1142_v57 = vmax.f32 %v1095_v3, 0.0 }
 0x346   :  { %v1150_v49 = vmax.f32 %v1135_v18, 0.0  ;;  %v934_v62 = vpop.permute.xlu0 %933  ;;  %v1145_v0 = vmax.f32 %v1110_v15, 0.0 }
 0x347   :  { %v1144_v12 = vmax.f32 %v1105_v50, 0.0  ;;  %v1090_v1 = vadd.f32 %v2417_v9, %v934_v62  ;;  %v1075_v9 = vadd.f32 %v2407_v41, %v919_v19 }
 0x348   :  { %1615 = vmatpush3.msk.msra.mxu0 %vm101_vm0, %v1150_v49 }
 0x349   :  { %1616 = vmatprep.subr.mxu0 %v2497_v24  ;;  %v1141_v60 = vmax.f32 %v1090_v1, 0.0  ;;  %v1138_v8 = vmax.f32 %v1075_v9, 0.0 }
 0x34a   :  { %1617 = vmatpush3.msra.mxu0 %v1149_v45  ;;  %v924_v55 = vpop.permute.xlu0 %923 }
 0x34b   :  { %1618 = vmatprep.subr.mxu0 %v2497_v24  ;;  %v1080_v21 = vadd.f32 %v2411_v29, %v924_v55 }
 0x34c   :  { %1619 = vmatpush3.msra.mxu0 %v1148_v30 }
 0x34d   :  { %1620 = vmatprep.subr.mxu0 %v2497_v24  ;;  %v1139_v52 = vmax.f32 %v1080_v21, 0.0 }
 0x34e   :  { %1621 = vmatpush3.msra.mxu0 %v1147_v2 }
 0x34f   :  { %1622 = vmatprep.subr.mxu0 %v2497_v24 }
 0x350   :  { %1623 = vmatpush3.msra.mxu0 %v1146_v20 }
 0x351   :  { %1624 = vmatprep.subr.mxu0 %v2497_v24 }
 0x352   :  { %1625 = vmatpush3.msra.mxu0 %v1145_v0 }
 0x353   :  { %1626 = vmatprep.subr.mxu0 %v2497_v24 }
 0x354   :  { %1627 = vmatpush3.msra.mxu0 %v1144_v12 }
 0x355   :  { %1628 = vmatprep.subr.mxu0 %v2497_v24 }
 0x356   :  { %1629 = vmatpush3.msra.mxu0 %v1143_v39 }
 0x357   :  { %1630 = vmatprep.subr.mxu0 %v2497_v24 }
 0x358   :  { %1631 = vmatpush3.msra.mxu0 %v1142_v57 }
 0x359   :  { %1632 = vmatprep.subr.mxu0 %v2497_v24 }
 0x35a   :  { %1633 = vmatpush3.msra.mxu0 %v1141_v60 }
 0x35b   :  { %1634 = vmatprep.subr.mxu0 %v2497_v24 }
 0x35c   :  { %1635 = vmatpush3.msra.mxu0 %v1140_v40 }
 0x35d   :  { %1636 = vmatprep.subr.mxu0 %v2497_v24 }
 0x35e   :  { %1637 = vmatpush3.msra.mxu0 %v1139_v52 }
 0x35f   :  { %1638 = vmatprep.subr.mxu0 %v2497_v24 }
 0x360   :  { %1639 = vmatpush3.msra.mxu0 %v1138_v8 }
 0x361   :  { %1641 = vmatmul.mubr.msk.f32.vlgmr.msra.gmra.mxu0 %vm1157_vm9, %v2403_v63  ;;  %v1155_v63 = vpop.permute.xlu0 %1154 }
 0x3f5   :  { %v1306_v41 = vpop.f32.mrf.mxu1 }
 0x3f7   :  { %v1649_v29 = vpop.f32.mrf.mxu1 }
 0x405   :  { %v1378_v4 = vpop.f32.mrf.mxu1 }
 0x406   :  { %v1379_v5 = vadd.f32 %v1378_v4, %v1306_v41 }
 0x407   :  { %v1668_v37 = vpop.f32.mrf.mxu1 }
 0x408   :  { %v1386_v38 = vadd.f32 %v1384_v59, %v1379_v5 }
 0x40a   :  { %1390 = vst.msk [vmem:[%s2489_s3] sm:$0xff] %vm1389_vm10, %v1386_v38 }
 0x421   :  { %v1229_v42 = vpop.f32.mrf.mxu0 }
 0x422   :  { %v1230_v6 = vadd.f32 %v1229_v42, %v1155_v63 }
 0x423   :  { %v1642_v16 = vpop.f32.mrf.mxu0 }
 0x424   :  { %1392 = vst.msk [vmem:[%s2489_s3 + $0x8] sm:$0xf] %vm1391_vm11, %v1230_v6 }

</bundles_post_ra>
